<compile_context>
chip_gen: v7x
topology: tpu7x:2x2x1
jax: 0.10.0
libtpu: 0.0.40
codegen_flags: <defaults>
</compile_context>

<pallas_src>
import functools

import jax
import jax.numpy as jnp
from jax import lax
from jax.experimental import pallas as pl
from jax.experimental.pallas import tpu as pltpu

_NEG_INF = -1e30  # finite "-inf": avoids exp(-inf - (-inf)) = NaN


# --------------------------------------------------------------------------- #
# Generation-aware configuration
# --------------------------------------------------------------------------- #
def _tpu_config():
    """Return (preferred_seq_tile, vmem_limit_bytes) for the local TPU."""
    seq_tile = 256                       # fills v6e/v7x's 256-wide MXU
    vmem_limit = 48 * 1024 * 1024        # safe everywhere (v7x: 64 MiB / core)
    try:
        kind = jax.devices()[0].device_kind.lower()
        if any(g in kind for g in ("v2", "v3", "v4", "v5")):
            seq_tile = 128               # 128-wide MXU generations (e.g. v5e)
    except Exception:
        pass
    try:
        cap = pltpu.get_tpu_info().vmem_capacity_bytes
        vmem_limit = min(int(cap * 3 // 4), 110 * 1024 * 1024)
    except Exception:
        pass
    return seq_tile, vmem_limit


def _pick_seq_tile(t, preferred):
    for cand in (preferred, 128):
        if t % cand == 0:
            return cand
    return t  # whole-sequence block (block_shape == full dim is always legal)


# --------------------------------------------------------------------------- #
# Kernels
# --------------------------------------------------------------------------- #
def _qkv_proj_kernel(x_ref, w_ref, b_ref, q_ref, kv_ref, *, c, scale):
    """Fused QKV projection, computed once per row tile. q is pre-scaled."""
    x = x_ref[0]                                                     # (TM, C)
    q = jnp.dot(x, w_ref[:, :c],
                preferred_element_type=jnp.float32) + b_ref[:, :c]
    kv = jnp.dot(x, w_ref[:, c:],
                 preferred_element_type=jnp.float32) + b_ref[:, c:]
    q_ref[0] = (q * scale).astype(q_ref.dtype)        # fold 1/sqrt(D) into q
    kv_ref[0] = kv.astype(kv_ref.dtype)


def _linear_kernel(x_ref, w_ref, b_ref, o_ref):
    """Plain row-tiled linear layer: o = x @ W + b (output projection)."""
    o_ref[0] = (jnp.dot(x_ref[0], w_ref[...],
                        preferred_element_type=jnp.float32)
                + b_ref[...]).astype(o_ref.dtype)


def _flash_attn_kernel(q_ref, kv_ref, o_ref, m_scr, l_scr, acc_scr,
                       *, n_heads, head_size, approx_recip):
    """One (batch, q_block, kv_block) step of causal flash attention.

    q_ref  : (1, TQ, C)  pre-scaled queries
    kv_ref : (1, TK, 2C) keys (first C columns) and values (last C columns)
    o_ref  : (1, TQ, C)  attention context (un-projected)
    scratch: m_scr/l_scr (H, TQ, 1) f32, acc_scr (TQ, C) f32 (lane-dense)
    """
    qi = pl.program_id(1)
    ki = pl.program_id(2)
    c = n_heads * head_size
    tq = q_ref.shape[1]
    tk = kv_ref.shape[1]

    @pl.when(ki == 0)
    def _init():
        m_scr[...] = jnp.full(m_scr.shape, _NEG_INF, dtype=m_scr.dtype)
        l_scr[...] = jnp.zeros(l_scr.shape, dtype=l_scr.dtype)
        acc_scr[...] = jnp.zeros(acc_scr.shape, dtype=acc_scr.dtype)

    def _update(masked):
        # Iota / mask work only on the diagonal block (masked=True).
        if masked:
            row = lax.broadcasted_iota(jnp.int32, (tq, tk), 0)
            col = lax.broadcasted_iota(jnp.int32, (tq, tk), 1)
            allow = col <= row
        # Static unroll over heads; per-head ref slices are zero-cost views,
        # so only one head's (TQ, TK) temporaries are live at a time.
        for h in range(n_heads):
            lo = h * head_size
            hi = lo + head_size
            q_h = q_ref[0, :, lo:hi]                     # (TQ, D), pre-scaled
            k_h = kv_ref[0, :, lo:hi]                    # (TK, D)
            v_h = kv_ref[0, :, c + lo:c + hi]            # (TK, D)

            # scores: contract over D; lane dim stays TK (MXU-friendly).
            s = lax.dot_general(q_h, k_h, (((1,), (1,)), ((), ())),
                                preferred_element_type=jnp.float32)  # (TQ, TK)
            if masked:
                s = jnp.where(allow, s, _NEG_INF)

            m_prev = m_scr[h]                                        # (TQ, 1)
            m_new = jnp.maximum(m_prev, jnp.max(s, axis=-1, keepdims=True))
            alpha = jnp.exp(m_prev - m_new)
            p = jnp.exp(s - m_new)                                   # f32

            l_scr[h] = alpha * l_scr[h] + jnp.sum(p, axis=-1, keepdims=True)
            acc_scr[:, lo:hi] = alpha * acc_scr[:, lo:hi] + jnp.dot(
                p.astype(v_h.dtype), v_h, preferred_element_type=jnp.float32)
            m_scr[h] = m_new

    @pl.when(ki < qi)         # strictly below the diagonal: no mask work
    def _off_diag():
        _update(masked=False)

    @pl.when(ki == qi)        # diagonal block: mask, then finalize
    def _diag():
        _update(masked=True)
        for h in range(n_heads):
            lo = h * head_size
            hi = lo + head_size
            inv_l = pl.reciprocal(l_scr[h], approx=approx_recip)
            acc_scr[:, lo:hi] = acc_scr[:, lo:hi] * inv_l
        o_ref[0] = acc_scr[...].astype(o_ref.dtype)     # one lane-dense store


# --------------------------------------------------------------------------- #
# Wrapper
# --------------------------------------------------------------------------- #
def attention_forward(x, w_qkv, b_qkv, w_proj, b_proj, *, n_heads):
    b, t, c = x.shape
    assert c % n_heads == 0
    head_size = c // n_heads
    scale = head_size ** -0.5
    dtype = x.dtype
    itemsize = jnp.dtype(dtype).itemsize

    preferred_tile, vmem_limit = _tpu_config()
    tile = _pick_seq_tile(t, preferred_tile)
    nt = t // tile

    # ---- 1) fused QKV projection: computed exactly once ---------------------
    # TODO(synk): for large C tile this matmul over Cin/Cout instead of keeping
    # the whole (C, 3C) weight as a single resident block.
    qkv_kernel = functools.partial(_qkv_proj_kernel, c=c, scale=scale)
    q, kv = pl.pallas_call(
        qkv_kernel,
        out_shape=(jax.ShapeDtypeStruct((b, t, c), dtype),
                   jax.ShapeDtypeStruct((b, t, 2 * c), dtype)),
        grid_spec=pltpu.PrefetchScalarGridSpec(
            num_scalar_prefetch=0,
            grid=(b, nt),
            in_specs=[
                pl.BlockSpec((1, tile, c), lambda bi, ti: (bi, ti, 0)),
                pl.BlockSpec((c, 3 * c), lambda bi, ti: (0, 0)),
                pl.BlockSpec((1, 3 * c), lambda bi, ti: (0, 0)),
            ],
            out_specs=[
                pl.BlockSpec((1, tile, c), lambda bi, ti: (bi, ti, 0)),
                pl.BlockSpec((1, tile, 2 * c), lambda bi, ti: (bi, ti, 0)),
            ],
        ),
        compiler_params=pltpu.CompilerParams(
            dimension_semantics=("parallel", "parallel"),
            vmem_limit_bytes=vmem_limit),
        cost_estimate=pl.CostEstimate(
            flops=2 * b * t * c * 3 * c,
            transcendentals=0,
            bytes_accessed=(b * t * c + c * 3 * c + b * t * 3 * c) * itemsize),
    )(x, w_qkv, b_qkv)

    # ---- 2) flash-attention core --------------------------------------------
    attn_kernel = functools.partial(
        _flash_attn_kernel, n_heads=n_heads, head_size=head_size,
        approx_recip=(dtype != jnp.float32))  # exact reciprocal on the f32 path

    ctx = pl.pallas_call(
        attn_kernel,
        out_shape=jax.ShapeDtypeStruct((b, t, c), dtype),
        grid_spec=pltpu.PrefetchScalarGridSpec(
            num_scalar_prefetch=0,
            grid=(b, nt, nt),
            in_specs=[
                pl.BlockSpec((1, tile, c), lambda bi, qi, ki: (bi, qi, 0)),
                # Clamp: causally-skipped steps (ki > qi) re-reference the
                # already-resident diagonal block -> no wasted HBM DMA.
                pl.BlockSpec((1, tile, 2 * c),
                             lambda bi, qi, ki: (bi, jnp.minimum(ki, qi), 0)),
            ],
            out_specs=pl.BlockSpec((1, tile, c), lambda bi, qi, ki: (bi, qi, 0)),
            scratch_shapes=[
                pltpu.VMEM((n_heads, tile, 1), jnp.float32),   # running max
                pltpu.VMEM((n_heads, tile, 1), jnp.float32),   # running sum
                pltpu.VMEM((tile, c), jnp.float32),            # lane-dense ctx
            ],
        ),
        compiler_params=pltpu.CompilerParams(
            dimension_semantics=("parallel", "parallel", "arbitrary"),
            vmem_limit_bytes=vmem_limit),
        cost_estimate=pl.CostEstimate(
            flops=2 * b * t * t * c,                  # QK^T + PV, lower triangle
            transcendentals=b * n_heads * t * t // 2,
            bytes_accessed=(b * t * c + b * t * 2 * c + b * t * c) * itemsize),
    )(q, kv)

    # ---- 3) output projection ------------------------------------------------
    out = pl.pallas_call(
        _linear_kernel,
        out_shape=jax.ShapeDtypeStruct((b, t, c), dtype),
        grid_spec=pltpu.PrefetchScalarGridSpec(
            num_scalar_prefetch=0,
            grid=(b, nt),
            in_specs=[
                pl.BlockSpec((1, tile, c), lambda bi, ti: (bi, ti, 0)),
                pl.BlockSpec((c, c), lambda bi, ti: (0, 0)),
                pl.BlockSpec((1, c), lambda bi, ti: (0, 0)),
            ],
            out_specs=pl.BlockSpec((1, tile, c), lambda bi, ti: (bi, ti, 0)),
        ),
        compiler_params=pltpu.CompilerParams(
            dimension_semantics=("parallel", "parallel"),
            vmem_limit_bytes=vmem_limit),
        cost_estimate=pl.CostEstimate(
            flops=2 * b * t * c * c,
            transcendentals=0,
            bytes_accessed=(2 * b * t * c + c * c) * itemsize),
    )(ctx, w_proj, b_proj)

    return out


# --------------------------------------------------------------------------- #
# Pure-JAX reference (mirrors the PyTorch forward, eval mode)
# --------------------------------------------------------------------------- #
def attention_reference(x, w_qkv, b_qkv, w_proj, b_proj, *, n_heads):
    b, t, c = x.shape
    hd = c // n_heads
    scale = hd ** -0.5
    qkv = x @ w_qkv + b_qkv[0]
    q, k, v = jnp.split(qkv, 3, axis=-1)
    q = q.reshape(b, t, n_heads, hd).transpose(0, 2, 1, 3)
    k = k.reshape(b, t, n_heads, hd).transpose(0, 2, 1, 3)
    v = v.reshape(b, t, n_heads, hd).transpose(0, 2, 1, 3)
    att = (q @ jnp.swapaxes(k, -2, -1)) * scale
    mask = jnp.tril(jnp.ones((t, t), bool))[None, None]
    att = jnp.where(mask, att, -jnp.inf)
    att = jax.nn.softmax(att, axis=-1)
    out = (att @ v).transpose(0, 2, 1, 3).reshape(b, t, c)
    return out @ w_proj + b_proj[0]


if __name__ == "__main__":
    # Small config consistent with the module: embed_dim=32, num_heads=4, seq_len=8
    B, T, C, H = 2, 8, 32, 4

    key = jax.random.PRNGKey(0)
    kx, k1, k2, k3, k4 = jax.random.split(key, 5)

    x = jax.random.normal(kx, (B, T, C), jnp.float32)
    w_qkv = jax.random.normal(k1, (C, 3 * C), jnp.float32) * (C ** -0.5)
    b_qkv = jax.random.normal(k2, (1, 3 * C), jnp.float32) * 0.02
    w_proj = jax.random.normal(k3, (C, C), jnp.float32) * (C ** -0.5)
    b_proj = jax.random.normal(k4, (1, C), jnp.float32) * 0.02

    ref = attention_reference(x, w_qkv, b_qkv, w_proj, b_proj, n_heads=H)

    # f32 path (exact reciprocal in finalize -> tight tolerance).
    out = attention_forward(x, w_qkv, b_qkv, w_proj, b_proj, n_heads=H)
    out = jax.block_until_ready(out)
    assert out.shape == (B, T, C)
    assert jnp.allclose(out, ref, atol=3e-3, rtol=3e-3), "f32 mismatch vs reference"

    # bf16 path: exercises the full-rate MXU (no f32 upcast) code path.
    xb = x.astype(jnp.bfloat16)
    out_bf16 = attention_forward(xb, w_qkv.astype(jnp.bfloat16),
                                 b_qkv.astype(jnp.bfloat16),
                                 w_proj.astype(jnp.bfloat16),
                                 b_proj.astype(jnp.bfloat16), n_heads=H)
    out_bf16 = jax.block_until_ready(out_bf16)
    assert out_bf16.shape == (B, T, C)
    assert jnp.allclose(out_bf16.astype(jnp.float32), ref, atol=5e-2, rtol=5e-2), \
        "bf16 mismatch vs reference"

    print("KERNEL_OK")
</pallas_src>

<mosaic_0001>
module attributes {stable_mosaic.version = 11 : i64} {
  func.func @_qkv_proj_kernel(%arg0: i32, %arg1: i32, %arg2: memref<1x8x32xf32, #tpu.memory_space<vmem>>, %arg3: memref<32x96xf32, #tpu.memory_space<vmem>>, %arg4: memref<1x96xf32, #tpu.memory_space<vmem>>, %arg5: memref<1x8x32xf32, #tpu.memory_space<vmem>>, %arg6: memref<1x8x64xf32, #tpu.memory_space<vmem>>) attributes {dimension_semantics = [#tpu.dimension_semantics<parallel>, #tpu.dimension_semantics<parallel>], iteration_bounds = array<i64: 2, 1>, scalar_prefetch = 0 : i64, scratch_operands = 0 : i64, tpu.core_type = #tpu.core_type<tc>, window_params = [{transform_indices = @transform_0, window_bounds = array<i64: 1, 8, 32>}, {pipeline_mode = #tpu.pipeline_mode<synchronous>, transform_indices = @transform_1, window_bounds = array<i64: 32, 96>}, {pipeline_mode = #tpu.pipeline_mode<synchronous>, transform_indices = @transform_2, window_bounds = array<i64: 1, 96>}, {transform_indices = @transform_3, window_bounds = array<i64: 1, 8, 32>}, {transform_indices = @transform_4, window_bounds = array<i64: 1, 8, 64>}]} {
    %c0 = arith.constant 0 : index
    %c0_0 = arith.constant 0 : index
    %c0_1 = arith.constant 0 : index
    %0 = vector.load %arg2[%c0, %c0_0, %c0_1] : memref<1x8x32xf32, #tpu.memory_space<vmem>>, vector<1x8x32xf32>
    %1 = vector.shape_cast %0 : vector<1x8x32xf32> to vector<8x32xf32>
    %c0_2 = arith.constant 0 : index
    %c0_3 = arith.constant 0 : index
    %2 = vector.load %arg3[%c0_2, %c0_3] : memref<32x96xf32, #tpu.memory_space<vmem>>, vector<32x32xf32>
    %cst = arith.constant dense<0.000000e+00> : vector<8x32xf32>
    %3 = tpu.matmul %1, %2, %cst {dimension_numbers = #tpu.dot_dimension_numbers<[1], [0], [0], [1], [0, 0, 1, 1], [], []>} : vector<8x32xf32>, vector<32x32xf32>, vector<8x32xf32> -> vector<8x32xf32>
    %c0_4 = arith.constant 0 : index
    %c0_5 = arith.constant 0 : index
    %4 = vector.load %arg4[%c0_4, %c0_5] : memref<1x96xf32, #tpu.memory_space<vmem>>, vector<1x32xf32>
    %5 = vector.broadcast %4 : vector<1x32xf32> to vector<8x32xf32>
    %6 = arith.addf %3, %5 : vector<8x32xf32>
    %c0_6 = arith.constant 0 : index
    %c32 = arith.constant 32 : index
    %7 = vector.load %arg3[%c0_6, %c32] : memref<32x96xf32, #tpu.memory_space<vmem>>, vector<32x64xf32>
    %cst_7 = arith.constant dense<0.000000e+00> : vector<8x64xf32>
    %8 = tpu.matmul %1, %7, %cst_7 {dimension_numbers = #tpu.dot_dimension_numbers<[1], [0], [0], [1], [0, 0, 1, 1], [], []>} : vector<8x32xf32>, vector<32x64xf32>, vector<8x64xf32> -> vector<8x64xf32>
    %c0_8 = arith.constant 0 : index
    %c32_9 = arith.constant 32 : index
    %9 = vector.load %arg4[%c0_8, %c32_9] : memref<1x96xf32, #tpu.memory_space<vmem>>, vector<1x64xf32>
    %10 = vector.broadcast %9 : vector<1x64xf32> to vector<8x64xf32>
    %11 = arith.addf %8, %10 : vector<8x64xf32>
    %cst_10 = arith.constant 0.353553385 : f32
    %12 = vector.broadcast %cst_10 : f32 to vector<8x32xf32>
    %13 = arith.mulf %6, %12 : vector<8x32xf32>
    %c0_11 = arith.constant 0 : index
    %c0_12 = arith.constant 0 : index
    %c0_13 = arith.constant 0 : index
    %14 = vector.load %arg5[%c0_11, %c0_12, %c0_13] : memref<1x8x32xf32, #tpu.memory_space<vmem>>, vector<1x8x32xf32>
    %15 = vector.shape_cast %14 : vector<1x8x32xf32> to vector<8x32xf32>
    %16 = vector.shape_cast %13 : vector<8x32xf32> to vector<1x8x32xf32>
    tpu.vector_store %arg5[%c0_11, %c0_12, %c0_13], %16 {strides = array<i32>} : memref<1x8x32xf32, #tpu.memory_space<vmem>>, vector<1x8x32xf32>,
    %c0_14 = arith.constant 0 : index
    %c0_15 = arith.constant 0 : index
    %c0_16 = arith.constant 0 : index
    %17 = vector.load %arg6[%c0_14, %c0_15, %c0_16] : memref<1x8x64xf32, #tpu.memory_space<vmem>>, vector<1x8x64xf32>
    %18 = vector.shape_cast %17 : vector<1x8x64xf32> to vector<8x64xf32>
    %19 = vector.shape_cast %11 : vector<8x64xf32> to vector<1x8x64xf32>
    tpu.vector_store %arg6[%c0_14, %c0_15, %c0_16], %19 {strides = array<i32>} : memref<1x8x64xf32, #tpu.memory_space<vmem>>, vector<1x8x64xf32>,
    return
  }
  func.func @transform_0(%arg0: i32, %arg1: i32) -> (i32, i32, i32) {
    %c0_i32 = arith.constant 0 : i32
    %c0_i32_0 = arith.constant 0 : i32
    return %arg0, %arg1, %c0_i32 : i32, i32, i32
  }
  func.func @transform_1(%arg0: i32, %arg1: i32) -> (i32, i32) {
    %c0_i32 = arith.constant 0 : i32
    %c0_i32_0 = arith.constant 0 : i32
    %c0_i32_1 = arith.constant 0 : i32
    return %c0_i32, %c0_i32_0 : i32, i32
  }
  func.func @transform_2(%arg0: i32, %arg1: i32) -> (i32, i32) {
    %c0_i32 = arith.constant 0 : i32
    %c0_i32_0 = arith.constant 0 : i32
    %c0_i32_1 = arith.constant 0 : i32
    return %c0_i32, %c0_i32_0 : i32, i32
  }
  func.func @transform_3(%arg0: i32, %arg1: i32) -> (i32, i32, i32) {
    %c0_i32 = arith.constant 0 : i32
    %c0_i32_0 = arith.constant 0 : i32
    return %arg0, %arg1, %c0_i32 : i32, i32, i32
  }
  func.func @transform_4(%arg0: i32, %arg1: i32) -> (i32, i32, i32) {
    %c0_i32 = arith.constant 0 : i32
    %c0_i32_0 = arith.constant 0 : i32
    return %arg0, %arg1, %c0_i32 : i32, i32, i32
  }
}

</mosaic_0001>

<bundles_post_ra>
// kernel: tpu_custom_call.1
= control target key start
LH: loop header
LB: loop body
LE: loop exit
PB: predicated region body
PF: predicated region fallthrough
CT: control target
= control target key end

     0   :  { %10 = vsyncpa [#allocation3], 0  ;;  %s1224_s0 = inlined_call_operand.hbm [shape: f32[2,8,32], index: 0, kind: input, shape index: {}]   ;;  %s1225_s1 = inlined_call_operand.hbm [shape: f32[32,96], index: 1, kind: input, shape index: {}]   ;;  %s1226_s2 = inlined_call_operand.vmem [shape: f32[1,96], index: 2, kind: input, shape index: {}]   ;;  %s1227_s3 = inlined_call_operand.hbm [shape: f32[2,8,32], index: 3, kind: output, shape index: {0}]   ;;  %s1228_s4 = inlined_call_operand.hbm [shape: f32[2,8,64], index: 4, kind: output, shape index: {1}]  }
   0x1   :  { %12 = vsyncpa [#allocation3 + $0x1], 0 }
   0x2   :  { %13 = vsyncpa [#allocation6], 0 }
   0x3   :  { %14 = vsyncpa [#allocation4], 0 }
   0x4   :  { %16 = vsyncpa [#allocation4 + $0x1], 0 }
   0x5   :  { %17 = vsyncpa [#allocation9], 0 }
   0x6   :  { %19 = vsyncpa [#allocation9 + $0x1], 0  ;;  %s966_s15 = smov 0   ;;  %s968_s16 = smov 0  }
   0x7   :  { %s970_s17 = smov 0   ;;  %s972_s18 = smov 0  }
   0x8   :  { %s974_s19 = smov 0   ;;  %s976_s20 = smov 0  }
   0x9 LB: > { %s594_s21 = sadd.s32 4294967295, %s929_s20   ;;  %s595_s22 = sadd.s32 4294967294, %s929_s20   ;;  %s929_s20 = sphi %s976_s20, %s25_s20   ;;  %s925_s19 = sphi %s974_s19, %s1252_s19   ;;  %s921_s18 = sphi %s972_s18, %s1251_s18   ;;  %s917_s17 = sphi %s970_s17, %s1250_s17   ;;  %s913_s16 = sphi %s968_s16, %s1249_s16   ;;  %s909_s15 = sphi %s966_s15, %s1248_s15  }
   0xa   : > { %p59_p0 = scmp.ne.s32.totalorder %s913_s16, %s909_s15  ;;  %p1000_p1 = scmp.eq.s32.totalorder %s594_s21, 0 }
   0xb   : > { %p1004_p2 = scmp.eq.s32.totalorder %s594_s21, 1  ;;  %p133_p3 = scmp.eq.s32.totalorder %s595_s22, 1 }
   0xc   : > { %s1233_s23 = scalar_select %p1000_p1, 1, 0 }
   0xd   : > { %s1234_s24 = scalar_select %p1004_p2, 1, 0 }
   0xe   : > { %p1010_p4 = por %p1000_p1, %p59_p0  ;;  %p596_p5 = scmp.ge.s32.totalorder %s929_s20, 1 }
   0xf   : > { %p1015_p6 = por %p133_p3, %p59_p0  ;;  %p168_p7 = scmp.lt.s32.totalorder %s929_s20, 3 }
  0x10   : > { %s1235_s25 = scalar_select %p1010_p4, 1, 0 }
  0x11   : > { %s1236_s26 = scalar_select %p1015_p6, 1, 0 }
  0x12   : > { %p1020_p8 = pnand %p596_p5, %p168_p7  ;;  %s931_s28 = smov [#allocation5]  }
  0x13   : > { %s180_s29 = sshll.u32 %s931_s28, 4  ;;  %s37_s5 = sadd.s32 1, %s925_s19  ;;  %s181_s29 = int_to_ptr.vmem [resolvable:$true] %s180_s29 }
  0x14   : > { %s1237_s27 = scalar_select %p1020_p8, 1, 0 }
  0x15   : > { %p669_p9 = pneg %p1020_p8  ;;  %s753_s8 = scalar_lea.hbm %s1225_s1, 512 }
  0x16   : > { %p754_p12 = scmp.ne.s32.totalorder %s1225_s1, %s753_s8  ;;  %p760_p5 = scmp.lt.u32.totalorder %s753_s8, %s1225_s1 }
  0x17   : > { %p1029_p11 = pnand %p669_p9, %p1000_p1 }
  0x19   : > { %p755_p13 = pneg %p1029_p11 }
  0x1b   : > { %p756_p0 = pnand %p755_p13, %p754_p12 }
  0x1d   : > { %p757_p3 = pneg %p756_p0 }
  0x1f   : > { %p762_p7 = pnand %p760_p5, %p757_p3 }
  0x21   : > { %765 = shalt.err (!%p762_p7)
}
  0x22   : > { %s766_s13 = scalar_lea.vmem %s181_s29, 512  ;;  %p774_p1 = scmp.lt.s32.totalorder %s181_s29, %s181_s29 }
  0x23   : > { %p767_p9 = scmp.ne.s32.totalorder %s181_s29, %s766_s13  ;;  %p775_p4 = scmp.lt.s32.totalorder %s766_s13, %s766_s13 }
  0x25   : > { %p769_p10 = pnand %p767_p9, %p755_p13  ;;  %p776_p8 = por %p775_p4, %p774_p1 }
  0x27   : > { %p770_p6 = pneg %p769_p10 }
  0x29   : > { %p777_p2 = pnand %p776_p8, %p770_p6 }
  0x2b   : > { %780 = shalt.err (!%p777_p2)
}
  0x2c   : > { %s932_s14 = smov 128   ;;  %s933_s21 = smov 8  }
  0x2d   : > { %672 = dma.hbm_to_vmem [thread:$0]  (!%p1029_p11), %s1225_s1, 512, %s181_s29, [#allocation6], %s932_s14, %s932_s14, %s933_s21  }
  0x2e   : > { %p39_p1 = scmp.ge.s32.totalorder %s37_s5, 2  ;;  %s46_s6 = sadd.s32 1, %s917_s17 }
  0x2f   : > { %p53_p2 = scmp.ne.s32.totalorder %s917_s17, %s913_s16  ;;  %p54_p4 = scmp.eq.s32.totalorder %s929_s20, 0 }
  0x30   : > { %s1254_s5 = smov (%p39_p1, %s37_s5), 0  ;;  %p1240_p8 = scmp.ne.s32.totalorder %s1234_s24, 0 }
  0x31   : > { %p1056_p6 = por %p54_p4, %p53_p2  ;;  %s41_s30 = ssub.s32 %s925_s19, %s1254_s5 }
  0x32   : > { %p1062_p10 = por %p1240_p8, %p53_p2  ;;  %p685_p12 = scmp.lt.s32.totalorder %s929_s20, 2 }
  0x33   : > { %p44_p11 = scmp.eq.s32.totalorder %s41_s30, 0  ;;  %s197_s29 = sand.u32 1, %s917_s17  }
  0x34   : > { %s599_s9 = sshll.u32 %s197_s29, 3  ;;  %s600_s11 = sshll.u32 %s925_s19, 7 }
  0x35   : > { %s1071_s10 = scalar_select %p44_p11, %s917_s17, %s46_s6  }
  0x36   : > { %s1077_s14 = scalar_lea.hbm %s1224_s0, %s600_s11  ;;  %s201_s24 = scalar_lea.vmem [#allocation2], %s599_s9 }
  0x37   : > { %s209_s21 = sshll.u32 %s201_s24, 4  ;;  %p1083_p13 = pnand %p685_p12, %p1056_p6  ;;  %s1079_s21 = int_to_ptr.vmem [resolvable:$true] %s209_s21 }
  0x38   : > { %s198_s28 = scalar_lea.sflag [#allocation3], %s197_s29  ;;  %s781_s6 = scalar_lea.hbm %s1077_s14, 128 }
  0x39   : > { %p782_p0 = scmp.ne.s32.totalorder %s1077_s14, %s781_s6  ;;  %p783_p3 = pneg %p1083_p13 }
  0x3a   : > { %s786_s11 = scalar_lea.hbm %s1224_s0, 256  ;;  %p787_p9 = scmp.lt.u32.totalorder %s1077_s14, %s1224_s0 }
  0x3b   : > { %p784_p5 = pnand %p783_p3, %p782_p0  ;;  %p788_p1 = scmp.lt.u32.totalorder %s786_s11, %s781_s6 }
  0x3c   : > { %p790_p4 = scmp.lt.u32.totalorder %s781_s6, %s1077_s14 }
  0x3d   : > { %p785_p7 = pneg %p784_p5  ;;  %p789_p2 = por %p788_p1, %p787_p9 }
  0x3f   : > { %p791_p6 = por %p790_p4, %p789_p2 }
  0x41   : > { %p792_p8 = pnand %p791_p6, %p785_p7 }
  0x43   : > { %795 = shalt.err (!%p792_p8)
}
  0x44   : > { %s796_s29 = scalar_lea.vmem %s1079_s21, 128  ;;  %s934_s13 = smov [#allocation2]  }
  0x45   : > { %p797_p12 = scmp.ne.s32.totalorder %s1079_s21, %s796_s29  ;;  %s801_s24 = sshll.u32 %s934_s13, 4  ;;  %s802_s24 = int_to_ptr.vmem [resolvable:$false] %s801_s24 }
  0x46   : > { %s803_s30 = scalar_lea.vmem %s802_s24, 256  ;;  %p804_p5 = scmp.lt.s32.totalorder %s1079_s21, %s802_s24 }
  0x47   : > { %p799_p11 = pnand %p797_p12, %p783_p3  ;;  %p805_p9 = scmp.lt.s32.totalorder %s803_s30, %s796_s29 }
  0x49   : > { %p800_p0 = pneg %p799_p11  ;;  %p806_p1 = por %p805_p9, %p804_p5 }
  0x4b   : > { %p807_p2 = pnand %p806_p1, %p800_p0 }
  0x4d   : > { %810 = shalt.err (!%p807_p2)
}
  0x4e   : > { %676 = dma.hbm_to_vmem [thread:$0]  (!%p1083_p13), %s1077_s14, 128, %s1079_s21, %s198_s28  }
  0x4f   : > { %p1243_p7 = scmp.ne.s32.totalorder %s1237_s27, 0 }
  0x50   : > { %s1115_s6 = sand.u32 (!%p1243_p7), 1, %s913_s16   ;;  %p1244_p3 = scmp.ne.s32.totalorder (!%p1243_p7), %s1235_s25, 0 }
  0x51   : > { %218 = sbr.rel (%p1243_p7) target bundleno = 450 (0x1c2), region = 32  ;;  %s1118_s9 = sshll.u32 (!%p1243_p7), %s1115_s6, 3 }
  0x52   : > { %s221_s11 = scalar_lea.sflag (!%p1243_p7), [#allocation3], %s1115_s6  ;;  %s224_s7 = scalar_lea.vmem (!%p1243_p7), [#allocation2], %s1118_s9 }
  0x58   : > { %892 = dma.done.wait (%p1244_p3), %s221_s11, 128  }
  0x59   : > { %894 = vsyncadd (%p1244_p3), %s221_s11, 4294967168  ;;  %p1245_p13 = scmp.ne.s32.totalorder %s1233_s23, 0 }
  0x5b   : > { %896 = dma.done.wait (%p1245_p13), [#allocation6], 512  }
  0x5c   : > { %898 = vsyncadd (%p1245_p13), [#allocation6], 4294966784  ;;  %v935_v0 = vmov 0.0|0.0   ;;  %vm936_vm0 = vmmov 0   ;;  %v937_v1 = vmov 0.0   ;;  %v259_v2 = vld [vmem:[#allocation5] sm:$0xff] }
  0x5d   : > { %647 = vmatprep.subr.bf16.mxu0 %v935_v0  ;;  %653 = vmatprep.subr.bf16.mxu1 %v935_v0  ;;  %v260_v3 = vld [vmem:[#allocation5 + $0x8] sm:$0xff]  ;;  %v261_v4 = vld [vmem:[#allocation5 + $0x10] sm:$0xff]  ;;  %v262_v6 = vld [vmem:[#allocation5 + $0x18] sm:$0xff]  ;;  %s938_s14 = smov 96   ;;  %vm270_vm1 = vcmask 261120   ;;  %s611_s23 = sshll.u32 %s921_s18, 7 }
  0x5e   : > { %633 = vmatprep.mubr.msk.f32.mxu0 %vm936_vm0, %v937_v1  ;;  %644 = vmatprep.mubr.msk.f32.mxu1 %vm936_vm0, %v937_v1  ;;  %v743_v5 = vpack.i.bf16 %v260_v3, %v259_v2  ;;  %v648_v7 = vpack.c.bf16 %v260_v3, %v259_v2  ;;  %v606_v8 = vld [vmem:[%s1226_s2] ss:$0 sm:$0xff]  ;;  %v748_v9 = vpack.i.bf16 %v262_v6, %v261_v4  ;;  %s250_s21 = scalar_lea.vmem [#allocation7], %s1118_s9  ;;  %s1142_s29 = scalar_lea.hbm %s1227_s3, %s611_s23 }
  0x5f   : > { %360 = vrot.lane.b32.xlu1 %v606_v8, %s938_s14  ;;  %v651_v10 = vpack.c.bf16 %v262_v6, %v261_v4  ;;  %v258_v11 = vld [vmem:[%s224_s7] sm:$0xff]  ;;  %s457_s22 = sshll.u32 %s250_s21, 4  ;;  %s438_s13 = scalar_lea.sflag [#allocation4], %s1115_s6  ;;  %s1144_s22 = int_to_ptr.vmem [resolvable:$true] %s457_s22 }
  0x60   : > { %744 = vrot.lane.b32.xlu0 %v743_v5, %s938_s14  ;;  %649 = vmatpush3.bf16.msra.mxu0 %v648_v7  ;;  %s811_s24 = scalar_lea.vmem %s1144_s22, 128  ;;  %s939_s30 = smov [#allocation7]  }
  0x61   : > { %650 = vmatprep.subr.bf16.mxu0 %v935_v0  ;;  %p812_p4 = scmp.ne.s32.totalorder %s1144_s22, %s811_s24  ;;  %s815_s11 = sshll.u32 %s939_s30, 4  ;;  %s816_s11 = int_to_ptr.vmem [resolvable:$false] %s815_s11 }
  0x62   : > { %s817_s7 = scalar_lea.vmem %s816_s11, 256  ;;  %p818_p12 = scmp.lt.s32.totalorder %s1144_s22, %s816_s11 }
  0x63   : > { %p813_p6 = pnand %p812_p4, %p1062_p10  ;;  %p819_p11 = scmp.lt.s32.totalorder %s817_s7, %s811_s24 }
  0x64   : > { %749 = vrot.lane.b32.xlu0 %v748_v9, %s938_s14  ;;  %652 = vmatpush3.bf16.msra.mxu0 %v651_v10 }
  0x65   : > { %p814_p8 = pneg %p813_p6  ;;  %p820_p0 = por %p819_p11, %p818_p12 }
  0x67   : > { %634 = vmatmul.mubr.msk.f32.vlgmr.msra.gmra.mrb[0].mxu0 %vm270_vm1, %v258_v11  ;;  %p821_p5 = pnand %p820_p0, %p814_p8 }
  0xd2   : > { %v745_v12 = vpop.permute.xlu0 %744 }
  0xd3   : > { %v747_v13 = vunpack.i.h.bf16 %v745_v12  ;;  %v746_v14 = vunpack.i.l.bf16 %v745_v12 }
  0xd5   : > { %v654_v15 = vpack.c.bf16 %v747_v13, %v746_v14 }
  0xd6   : > { %v750_v16 = vpop.permute.xlu0 %749 }
  0xd7   : > { %v752_v17 = vunpack.i.h.bf16 %v750_v16  ;;  %v751_v18 = vunpack.i.l.bf16 %v750_v16  ;;  %655 = vmatpush3.bf16.msra.mxu1 %v654_v15 }
  0xd8   : > { %656 = vmatprep.subr.bf16.mxu1 %v935_v0 }
  0xd9   : > { %v657_v19 = vpack.c.bf16 %v752_v17, %v751_v18 }
  0xdb   : > { %658 = vmatpush3.bf16.msra.mxu1 %v657_v19 }
  0xde   : > { %645 = vmatmul.mubr.msk.f32.vlgmr.msra.gmra.mrb[0].mxu1 %vm270_vm1, %v258_v11 }
 0x13a   : > { %v340_v20 = vpop.f32.mrb[0].mxu0 }
 0x13b   : > { %v341_v21 = vadd.f32 %v606_v8, %v340_v20  ;;  %v635_v22 = vpop.f32.mrb[1].mxu0 }
 0x13d   : > { %v433_v23 = vmul.f32 0.35355338, %v341_v21 }
 0x13f   : > { %434 = vst.msk [vmem:[%s250_s21] sm:$0xff] %vm270_vm1, %v433_v23 }
 0x140   : > { %824 = shalt.err (!%p821_p5)
}
 0x141   : > { %s825_s25 = scalar_lea.hbm %s1142_s29, 128  ;;  %s829_s21 = scalar_lea.hbm %s1227_s3, 256 }
 0x142   : > { %p826_p9 = scmp.ne.s32.totalorder %s1142_s29, %s825_s25  ;;  %p830_p7 = scmp.lt.u32.totalorder %s1142_s29, %s1227_s3 }
 0x143   : > { %p831_p3 = scmp.lt.u32.totalorder %s829_s21, %s825_s25  ;;  %p833_p4 = scmp.lt.u32.totalorder %s825_s25, %s1142_s29 }
 0x144   : > { %p827_p1 = pnand %p826_p9, %p1062_p10 }
 0x145   : > { %p832_p13 = por %p831_p3, %p830_p7 }
 0x146   : > { %p828_p2 = pneg %p827_p1 }
 0x147   : > { %p834_p6 = por %p833_p4, %p832_p13 }
 0x149   : > { %p835_p8 = pnand %p834_p6, %p828_p2 }
 0x14b   : > { %838 = shalt.err (!%p835_p8)
}
 0x14c   : > { %665 = dma.vmem_to_hbm [thread:$0]  (%p1062_p10), %s1144_s22, 128, %s1142_s29, %s438_s13   ;;  %v361_v24 = vpop.permute.xlu1 %360  ;;  %vm435_vm2 = vcmask 523264  }
 0x14d   : > { %s257_s24 = scalar_lea.vmem [#allocation8], %s1118_s9  ;;  %s1175_s25 = scalar_lea.hbm %s1228_s4, %s611_s23 }
 0x14e   : > { %s471_s30 = sshll.u32 %s257_s24, 4  ;;  %s443_s22 = scalar_lea.sflag [#allocation9], %s1115_s6  ;;  %s1177_s30 = int_to_ptr.vmem [resolvable:$true] %s471_s30 }
 0x14f   : > { %s839_s29 = scalar_lea.vmem %s1177_s30, 128  ;;  %s940_s9 = smov [#allocation8]  }
 0x150   : > { %p840_p12 = scmp.ne.s32.totalorder %s1177_s30, %s839_s29  ;;  %s843_s13 = sshll.u32 %s940_s9, 4  ;;  %s844_s13 = int_to_ptr.vmem [resolvable:$false] %s843_s13 }
 0x151   : > { %s845_s18 = scalar_lea.vmem %s844_s13, 256  ;;  %p846_p5 = scmp.lt.s32.totalorder %s1177_s30, %s844_s13 }
 0x152   : > { %p841_p11 = pnand %p840_p12, %p1062_p10  ;;  %p847_p9 = scmp.lt.s32.totalorder %s845_s18, %s839_s29 }
 0x154   : > { %p842_p0 = pneg %p841_p11  ;;  %p848_p1 = por %p847_p9, %p846_p5 }
 0x156   : > { %p849_p2 = pnand %p848_p1, %p842_p0 }
 0x1b1   : > { %v429_v25 = vpop.f32.mrb[0].mxu1 }
 0x1b2   : > { %v430_v26 = vadd.f32 %v429_v25, %v361_v24  ;;  %v646_v27 = vpop.f32.mrb[1].mxu1 }
 0x1b4   : > { %436 = vst.msk [vmem:[%s257_s24] sm:$0xff] %vm435_vm2, %v430_v26 }
 0x1b5   : > { %852 = shalt.err (!%p849_p2)
}
 0x1b6   : > { %s853_s6 = scalar_lea.hbm %s1175_s25, 128  ;;  %s857_s14 = scalar_lea.hbm %s1228_s4, 256 }
 0x1b7   : > { %p854_p7 = scmp.ne.s32.totalorder %s1175_s25, %s853_s6  ;;  %p858_p4 = scmp.lt.u32.totalorder %s1175_s25, %s1228_s4 }
 0x1b8   : > { %p859_p6 = scmp.lt.u32.totalorder %s857_s14, %s853_s6  ;;  %p861_p12 = scmp.lt.u32.totalorder %s853_s6, %s1175_s25 }
 0x1b9   : > { %p855_p3 = pnand %p854_p7, %p1062_p10 }
 0x1ba   : > { %p860_p8 = por %p859_p6, %p858_p4 }
 0x1bb   : > { %p856_p13 = pneg %p855_p3 }
 0x1bc   : > { %p862_p11 = por %p861_p12, %p860_p8 }
 0x1be   : > { %p863_p0 = pnand %p862_p11, %p856_p13 }
 0x1c0   : > { %866 = shalt.err (!%p863_p0)
}
 0x1c1   : > { %666 = dma.vmem_to_hbm [thread:$0]  (%p1062_p10), %s1177_s30, 128, %s1175_s25, %s443_s22  }
 0x1c2 PF: > { %s483_s12 = sand.u32 1, %s909_s15   ;;  %p1246_p5 = scmp.ne.s32.totalorder %s1236_s26, 0 }
 0x1c3   : > { %p1247_p9 = scmp.ge.s32.totalorder %s929_s20, 2  ;;  %s484_s24 = scalar_lea.sflag [#allocation4], %s483_s12 }
 0x1c5   : > { %p678_p1 = pnand %p1247_p9, %p1246_p5 }
 0x1c7   : > { %900 = dma.done.wait (!%p678_p1), %s484_s24, 128  }
 0x1c8   : > { %902 = vsyncadd (!%p678_p1), %s484_s24, 4294967168  ;;  %s493_s11 = scalar_lea.sflag [#allocation9], %s483_s12 }
 0x1c9   : > { %904 = dma.done.wait (!%p678_p1), %s493_s11, 128  }
 0x1ca   : > { %906 = vsyncadd (!%p678_p1), %s493_s11, 4294967168  ;;  %s25_s20 = sadd.s32 1, %s929_s20   ;;  %s1248_s15 = smov %s913_s16 }
 0x1cb   : > { %p22_p2 = scmp.ge.s32.totalorder %s25_s20, 4   ;;  %s1249_s16 = smov %s917_s17 }
 0x1cc   : > { %s1250_s17 = smov %s1071_s10  ;;  %s1251_s18 = smov %s925_s19 }
 0x1cd   : > { %s1252_s19 = smov %s1254_s5  ;;  %24 = sbr.rel (!%p22_p2) target bundleno = 9 (0x9), region = 98 }
 0x1d4   :  { %498 = vsyncpa [#allocation3], 1 }
 0x1d5   :  { %500 = vsyncpa [#allocation3 + $0x1], 1 }
 0x1d6   :  { %501 = vsyncpa [#allocation6], 1 }
 0x1d7   :  { %502 = vsyncpa [#allocation4], 1 }
 0x1d8   :  { %504 = vsyncpa [#allocation4 + $0x1], 1 }
 0x1d9   :  { %505 = vsyncpa [#allocation9], 1 }
 0x1da   :  { %507 = vsyncpa [#allocation9 + $0x1], 1 }

</bundles_post_ra>
